<compile_context>
chip_gen: v7x
topology: tpu7x:2x2x1
jax: 0.10.0
libtpu: 0.0.40
codegen_flags: <defaults>
</compile_context>

<pallas_src>
import numpy as np
import jax
import jax.numpy as jnp
from jax.experimental import pallas as pl
from jax.experimental.pallas import tpu as pltpu

payoff_values = np.asarray(
    [[[[10, 0, 0], [4, 8, 4], [10, 0, 0]], [[0, 0, 10], [4, 8, 4], [0, 0, 10]]],
     [[[0, 0, 10], [4, 8, 4], [0, 0, 0]], [[10, 0, 0], [4, 8, 4], [10, 0, 0]]]],
    dtype=np.float32)

NUM_ACTIONS = payoff_values.shape[-1]   # 3
NUM_CARDS = payoff_values.shape[0]      # 2
BATCH = 32                              # matches the module's hard-coded batch_size


def _a0_kernel(w_ref, b_ref, cards_ref, g_ref, out_ref):
    C, A, B = NUM_CARDS, NUM_ACTIONS, BATCH

    # ---- linear layer: one_hot(card) @ W^T + b == W^T + b (identity one-hots),
    # so the degenerate 2x2 @ 2x3 MXU matmul is replaced by one VPU add. ----
    logits = w_ref[...] + b_ref[...]                                   # (C, A, 1)

    # ---- log-softmax over actions (axis 1) ----
    mx = jnp.max(logits, axis=1, keepdims=True)
    sh = logits - mx
    lse = jnp.log(jnp.sum(jnp.exp(sh), axis=1, keepdims=True))
    log_p = sh - lse                                                   # (C, A, 1)

    # ---- categorical sample per (card, batch) via Gumbel-max, fully vectorized:
    # one (C, A, B) perturbation, argmax over the action (sublane) axis. ----
    pert = log_p + g_ref[...]                                          # (C, A, B)
    a_iota = jax.lax.broadcasted_iota(jnp.int32, (C, A, B), 1)
    is_max = pert == jnp.max(pert, axis=1, keepdims=True)
    cf = jnp.min(jnp.where(is_max, a_iota, A), axis=1, keepdims=True)  # (C,1,B) int32
    logcf = jnp.sum(jnp.where(a_iota == cf, log_p, 0.0),
                    axis=1, keepdims=True)                             # (C, 1, B)

    # ---- u0[b] = cf_action[cards_0[b], b] (gather via one-hot reduce over cards) ----
    cards = cards_ref[...]                                             # (1, 1, B)
    c_iota = jax.lax.broadcasted_iota(jnp.int32, (C, 1, B), 0)
    u0 = jnp.sum(jnp.where(c_iota == cards, cf, 0),
                 axis=0, keepdims=True)                                # (1, 1, B)

    # ---- beliefs: normalized match between u0 and per-card counterfactual actions ----
    w_eq = (cf == u0).astype(jnp.float32)                              # (C, 1, B)
    beliefs = w_eq / jnp.sum(w_eq, axis=0, keepdims=True)

    # ---- single merged output slab: row 0 = u0, rows 1..C = beliefs,
    # rows C+1..2C = log_cf (batch stays on the lane axis) ----
    out_ref[0:1] = u0.astype(jnp.float32)
    out_ref[1:1 + C] = beliefs
    out_ref[1 + C:1 + 2 * C] = logcf


def a0_forward(cards_0, weight, bias, seed=0):
    """cards_0: (BATCH,) int32.
    weight: (NUM_ACTIONS, NUM_CARDS) -- torch nn.Linear layout. bias: (NUM_ACTIONS,)."""
    C, A, B = NUM_CARDS, NUM_ACTIONS, BATCH
    w3 = jnp.asarray(weight, jnp.float32).T.reshape(C, A, 1)   # W^T, per-card rows
    b3 = jnp.asarray(bias, jnp.float32).reshape(1, A, 1)
    cards = jnp.asarray(cards_0, jnp.int32).reshape(1, 1, B)
    # TODO(synk): torch.distributions.Multinomial uses torch's RNG; sampling is
    # reproduced via Gumbel-max with jax.random noise (distributionally equal, not
    # bit-identical).  Noise is generated host-side because the in-kernel hardware
    # PRNG (pltpu.prng_seed) does not lower on the CPU/interpret path.
    gumbel = jax.random.gumbel(jax.random.PRNGKey(seed), (C, A, B), dtype=jnp.float32)

    out = pl.pallas_call(
        _a0_kernel,
        out_shape=jax.ShapeDtypeStruct((1 + 2 * C, 1, B), jnp.float32),
        in_specs=[
            pl.BlockSpec(memory_space=pltpu.MemorySpace.VMEM),   # W^T       (C, A, 1)
            pl.BlockSpec(memory_space=pltpu.MemorySpace.VMEM),   # bias      (1, A, 1)
            pl.BlockSpec(memory_space=pltpu.MemorySpace.VMEM),   # cards_0   (1, 1, B)
            pl.BlockSpec(memory_space=pltpu.MemorySpace.VMEM),   # gumbel    (C, A, B)
        ],
        out_specs=pl.BlockSpec(memory_space=pltpu.MemorySpace.VMEM),
    )(w3, b3, cards, gumbel)

    u0 = out[0, 0].astype(jnp.int32)            # (B,)
    beliefs = out[1:1 + C, 0].T                 # (B, C)
    log_cf = out[1 + C:1 + 2 * C, 0].T          # (B, C)
    return u0, beliefs, log_cf


if __name__ == "__main__":
    key = jax.random.PRNGKey(0)
    k_w, k_b, k_cards = jax.random.split(key, 3)

    # nn.Linear(num_cards, num_actions) default init: U(-1/sqrt(in), 1/sqrt(in))
    bound = 1.0 / np.sqrt(NUM_CARDS)
    w_torch = jax.random.uniform(k_w, (NUM_ACTIONS, NUM_CARDS),
                                 minval=-bound, maxval=bound)
    b_torch = jax.random.uniform(k_b, (NUM_ACTIONS,), minval=-bound, maxval=bound)
    cards_0 = jax.random.randint(k_cards, (BATCH,), 0, NUM_CARDS, dtype=jnp.int32)

    u0, beliefs, log_cf = a0_forward(cards_0, w_torch, b_torch, seed=1234)
    jax.block_until_ready((u0, beliefs, log_cf))

    # light sanity checks
    assert u0.shape == (BATCH,) and beliefs.shape == (BATCH, NUM_CARDS)
    assert log_cf.shape == (BATCH, NUM_CARDS)
    assert bool(jnp.all((u0 >= 0) & (u0 < NUM_ACTIONS)))
    assert bool(jnp.allclose(jnp.sum(beliefs, axis=-1), 1.0, atol=1e-5))
    assert bool(jnp.all(log_cf <= 0.0))

    print("KERNEL_OK")
</pallas_src>

<mosaic_0001>
module attributes {stable_mosaic.version = 11 : i64} {
  func.func @_a0_kernel(%arg0: memref<2x3x1xf32, #tpu.memory_space<vmem>>, %arg1: memref<1x3x1xf32, #tpu.memory_space<vmem>>, %arg2: memref<1x1x32xi32, #tpu.memory_space<vmem>>, %arg3: memref<2x3x32xf32, #tpu.memory_space<vmem>>, %arg4: memref<5x1x32xf32, #tpu.memory_space<vmem>>) attributes {dimension_semantics = [], scalar_prefetch = 0 : i64, scratch_operands = 0 : i64, tpu.core_type = #tpu.core_type<tc>} {
    %c0 = arith.constant 0 : index
    %c0_0 = arith.constant 0 : index
    %c0_1 = arith.constant 0 : index
    %0 = vector.load %arg0[%c0, %c0_0, %c0_1] : memref<2x3x1xf32, #tpu.memory_space<vmem>>, vector<2x3x1xf32>
    %c0_2 = arith.constant 0 : index
    %c0_3 = arith.constant 0 : index
    %c0_4 = arith.constant 0 : index
    %1 = vector.load %arg1[%c0_2, %c0_3, %c0_4] : memref<1x3x1xf32, #tpu.memory_space<vmem>>, vector<1x3x1xf32>
    %2 = vector.broadcast %1 : vector<1x3x1xf32> to vector<2x3x1xf32>
    %3 = arith.addf %0, %2 : vector<2x3x1xf32>
    %cst = arith.constant dense<0xFF800000> : vector<2x1xf32>
    %4 = vector.multi_reduction <maximumf>, %3, %cst [1] : vector<2x3x1xf32> to vector<2x1xf32>
    %5 = vector.shape_cast %4 : vector<2x1xf32> to vector<2x1x1xf32>
    %6 = vector.broadcast %5 : vector<2x1x1xf32> to vector<2x3x1xf32>
    %7 = arith.subf %3, %6 : vector<2x3x1xf32>
    %8 = math.exp %7 : vector<2x3x1xf32>
    %cst_5 = arith.constant dense<0.000000e+00> : vector<2x1xf32>
    %9 = vector.multi_reduction <add>, %8, %cst_5 [1] : vector<2x3x1xf32> to vector<2x1xf32>
    %10 = vector.shape_cast %9 : vector<2x1xf32> to vector<2x1x1xf32>
    %11 = math.log %10 : vector<2x1x1xf32>
    %12 = vector.broadcast %11 : vector<2x1x1xf32> to vector<2x3x1xf32>
    %13 = arith.subf %7, %12 : vector<2x3x1xf32>
    %c0_6 = arith.constant 0 : index
    %c0_7 = arith.constant 0 : index
    %c0_8 = arith.constant 0 : index
    %14 = vector.load %arg3[%c0_6, %c0_7, %c0_8] : memref<2x3x32xf32, #tpu.memory_space<vmem>>, vector<2x3x32xf32>
    %15 = vector.broadcast %13 : vector<2x3x1xf32> to vector<2x3x32xf32>
    %16 = arith.addf %15, %14 : vector<2x3x32xf32>
    %17 = tpu.iota {dimensions = array<i32: 1>} : vector<2x3x32xi32>
    %cst_9 = arith.constant dense<0xFF800000> : vector<2x32xf32>
    %18 = vector.multi_reduction <maximumf>, %16, %cst_9 [1] : vector<2x3x32xf32> to vector<2x32xf32>
    %19 = vector.shape_cast %18 : vector<2x32xf32> to vector<2x1x32xf32>
    %20 = vector.broadcast %19 : vector<2x1x32xf32> to vector<2x3x32xf32>
    %21 = arith.cmpf oeq, %16, %20 : vector<2x3x32xf32>
    %c3_i32 = arith.constant 3 : i32
    %22 = vector.broadcast %c3_i32 : i32 to vector<2x3x32xi32>
    %23 = arith.select %21, %17, %22 : vector<2x3x32xi1>, vector<2x3x32xi32>
    %cst_10 = arith.constant dense<2147483647> : vector<2x32xi32>
    %24 = vector.multi_reduction <minsi>, %23, %cst_10 [1] : vector<2x3x32xi32> to vector<2x32xi32>
    %25 = vector.shape_cast %24 : vector<2x32xi32> to vector<2x1x32xi32>
    %26 = vector.broadcast %25 : vector<2x1x32xi32> to vector<2x3x32xi32>
    %27 = arith.cmpi eq, %17, %26 : vector<2x3x32xi32>
    %cst_11 = arith.constant 0.000000e+00 : f32
    %28 = vector.shape_cast %13 : vector<2x3x1xf32> to vector<2x3x1xf32>
    %29 = vector.broadcast %28 : vector<2x3x1xf32> to vector<2x3x32xf32>
    %30 = vector.broadcast %cst_11 : f32 to vector<2x3x32xf32>
    %31 = arith.select %27, %29, %30 : vector<2x3x32xi1>, vector<2x3x32xf32>
    %cst_12 = arith.constant dense<0.000000e+00> : vector<2x32xf32>
    %32 = vector.multi_reduction <add>, %31, %cst_12 [1] : vector<2x3x32xf32> to vector<2x32xf32>
    %33 = vector.shape_cast %32 : vector<2x32xf32> to vector<2x1x32xf32>
    %c0_13 = arith.constant 0 : index
    %c0_14 = arith.constant 0 : index
    %c0_15 = arith.constant 0 : index
    %34 = vector.load %arg2[%c0_13, %c0_14, %c0_15] : memref<1x1x32xi32, #tpu.memory_space<vmem>>, vector<1x1x32xi32>
    %35 = tpu.iota {dimensions = array<i32: 0>} : vector<2x1x32xi32>
    %36 = vector.broadcast %34 : vector<1x1x32xi32> to vector<2x1x32xi32>
    %37 = arith.cmpi eq, %35, %36 : vector<2x1x32xi32>
    %c0_i32 = arith.constant 0 : i32
    %38 = vector.broadcast %c0_i32 : i32 to vector<2x1x32xi32>
    %39 = arith.select %37, %25, %38 : vector<2x1x32xi1>, vector<2x1x32xi32>
    %cst_16 = arith.constant dense<0> : vector<1x32xi32>
    %40 = vector.multi_reduction <add>, %39, %cst_16 [0] : vector<2x1x32xi32> to vector<1x32xi32>
    %41 = vector.shape_cast %40 : vector<1x32xi32> to vector<1x1x32xi32>
    %42 = vector.broadcast %41 : vector<1x1x32xi32> to vector<2x1x32xi32>
    %43 = arith.cmpi eq, %25, %42 : vector<2x1x32xi32>
    %44 = arith.extui %43 : vector<2x1x32xi1> to vector<2x1x32xi32>
    %45 = arith.sitofp %44 : vector<2x1x32xi32> to vector<2x1x32xf32>
    %cst_17 = arith.constant dense<0.000000e+00> : vector<1x32xf32>
    %46 = vector.multi_reduction <add>, %45, %cst_17 [0] : vector<2x1x32xf32> to vector<1x32xf32>
    %47 = vector.shape_cast %46 : vector<1x32xf32> to vector<1x1x32xf32>
    %48 = vector.broadcast %47 : vector<1x1x32xf32> to vector<2x1x32xf32>
    %49 = arith.divf %45, %48 : vector<2x1x32xf32>
    %50 = arith.sitofp %41 : vector<1x1x32xi32> to vector<1x1x32xf32>
    %c0_18 = arith.constant 0 : index
    %c0_19 = arith.constant 0 : index
    %c0_20 = arith.constant 0 : index
    %51 = vector.load %arg4[%c0_18, %c0_19, %c0_20] : memref<5x1x32xf32, #tpu.memory_space<vmem>>, vector<1x1x32xf32>
    tpu.vector_store %arg4[%c0_18, %c0_19, %c0_20], %50 {strides = array<i32>} : memref<5x1x32xf32, #tpu.memory_space<vmem>>, vector<1x1x32xf32>,
    %c1 = arith.constant 1 : index
    %c0_21 = arith.constant 0 : index
    %c0_22 = arith.constant 0 : index
    %52 = vector.load %arg4[%c1, %c0_21, %c0_22] : memref<5x1x32xf32, #tpu.memory_space<vmem>>, vector<2x1x32xf32>
    tpu.vector_store %arg4[%c1, %c0_21, %c0_22], %49 {strides = array<i32>} : memref<5x1x32xf32, #tpu.memory_space<vmem>>, vector<2x1x32xf32>,
    %c3 = arith.constant 3 : index
    %c0_23 = arith.constant 0 : index
    %c0_24 = arith.constant 0 : index
    %53 = vector.load %arg4[%c3, %c0_23, %c0_24] : memref<5x1x32xf32, #tpu.memory_space<vmem>>, vector<2x1x32xf32>
    tpu.vector_store %arg4[%c3, %c0_23, %c0_24], %33 {strides = array<i32>} : memref<5x1x32xf32, #tpu.memory_space<vmem>>, vector<2x1x32xf32>,
    return
  }
}

</mosaic_0001>

<bundles_post_ra>
// kernel: tpu_custom_call.1
= control target key start
LH: loop header
LB: loop body
LE: loop exit
PB: predicated region body
PF: predicated region fallthrough
CT: control target
= control target key end

     0   :  { %v228_v2 = vmov 0   ;;  %vm23_vm0 = vcmask 2048   ;;  %s305_s0 = inlined_call_operand.vmem [shape: f32[2,3,1], index: 0, kind: input, shape index: {}]   ;;  %s306_s1 = inlined_call_operand.vmem [shape: f32[1,3,1], index: 1, kind: input, shape index: {}]   ;;  %s307_s2 = inlined_call_operand.vmem [shape: s32[1,1,32], index: 2, kind: input, shape index: {}]   ;;  %s308_s3 = inlined_call_operand.vmem [shape: f32[2,3,32], index: 3, kind: input, shape index: {}]   ;;  %s309_s4 = inlined_call_operand.hbm [shape: f32[5,1,32], index: 4, kind: output, shape index: {}]  }
   0x1   :  { %v18_v0 = vld [vmem:[%s305_s0] sm:$0x7]  ;;  %v19_v1 = vld [vmem:[%s305_s0 + $0x4] sm:$0x7]  ;;  %193 = vset.pattern.permute.xlu0 %v228_v2 }
   0x2   :  { %v20_v3 = vld [vmem:[%s306_s1] sm:$0x7] }
   0x3   :  { %v21_v4 = vadd.f32 %v20_v3, %v18_v0  ;;  %v22_v5 = vadd.f32 %v20_v3, %v19_v1 }
   0x4   :  { %9 = vsyncpa [#allocation3], 0  ;;  %v64_v46 = vld [vmem:[%s308_s3] sm:$0x7]  ;;  %vm80_vm1 = vcmask 256000   ;;  %v78_v58 = vlaneseq  ;;  %vm155_vm15 = vcmask 253952  }
   0x5   :  { %v24_v6 = vsel %vm23_vm0, %v21_v4, -inf  ;;  %v31_v7 = vsel %vm23_vm0, %v22_v5, -inf  ;;  %v65_v49 = vld [vmem:[%s308_s3 + $0x4] sm:$0x7] }
   0x6   :  { %v25_v8 = vrot.slane %v24_v6, 4  ;;  %v32_v9 = vrot.slane %v31_v7, 4  ;;  %v79_v63 = vshrl.u32 %v78_v58, 7  ;;  %vm144_vm12 = vcmp.lt.s32.totalorder %v78_v58, 32 }
   0x8   :  { %v26_v10 = vmax.f32 %v24_v6, %v25_v8  ;;  %v33_v11 = vmax.f32 %v31_v7, %v32_v9 }
   0xa   :  { %v27_v12 = vrot.slane %v26_v10, 2  ;;  %v34_v13 = vrot.slane %v33_v11, 2 }
   0xc   :  { %v28_v14 = vmax.f32 %v26_v10, %v27_v12  ;;  %v35_v15 = vmax.f32 %v33_v11, %v34_v13 }
   0xe   :  { %v29_v16 = vrot.slane %v28_v14, 1  ;;  %v36_v17 = vrot.slane %v35_v15, 1 }
  0x10   :  { %v30_v18 = vmax.f32 %v28_v14, %v29_v16  ;;  %v37_v19 = vmax.f32 %v35_v15, %v36_v17  ;;  %v137_v14 = vld [vmem:[%s307_s2] sm:$0x1]  ;;  %s230_s2 = smov [#allocation2]  }
  0x11   :  { %vm138_vm9 = vcmp.eq.s32.totalorder %v137_v14, 0  ;;  %vm139_vm11 = vcmp.eq.s32.totalorder %v137_v14, 1  ;;  %s175_s24 = sshll.u32 %s230_s2, 4  ;;  %s176_s24 = int_to_ptr.vmem [resolvable:$true] %s175_s24 }
  0x12   :  { %v38_v20 = vsub.f32 %v21_v4, %v30_v18  ;;  %v39_v21 = vsub.f32 %v22_v5, %v37_v19  ;;  %s204_s25 = scalar_lea.vmem %s176_s24, 80  ;;  %s208_s26 = scalar_lea.vmem %s176_s24, 96 }
  0x13   :  { %p205_p0 = scmp.ne.s32.totalorder %s176_s24, %s204_s25  ;;  %p209_p1 = scmp.lt.s32.totalorder %s176_s24, %s176_s24 }
  0x14   :  { %v40_v22 = vmul.f32 1.442695, %v38_v20  ;;  %v42_v23 = vmul.f32 1.442695, %v39_v21  ;;  %p210_p2 = scmp.lt.s32.totalorder %s208_s26, %s204_s25 }
  0x16   :  { %194 = vpow2.f32 %v40_v22  ;;  %p211_p3 = por %p210_p2, %p209_p1 }
  0x17   :  { %196 = vpow2.f32 %v42_v23 }
  0x18   :  { %p212_p4 = pnand %p211_p3, %p205_p0 }
  0x20   :  { %v195_v24 = vpop.eup %194 }
  0x21   :  { %v197_v25 = vpop.eup %196  ;;  %v44_v26 = vsel %vm23_vm0, %v195_v24, 0.0 }
  0x22   :  { %v45_v27 = vrot.slane %v44_v26, 4  ;;  %v51_v28 = vsel %vm23_vm0, %v197_v25, 0.0 }
  0x23   :  { %v52_v29 = vrot.slane %v51_v28, 4 }
  0x24   :  { %v46_v30 = vadd.f32 %v45_v27, %v44_v26 }
  0x25   :  { %v53_v31 = vadd.f32 %v52_v29, %v51_v28 }
  0x26   :  { %v47_v32 = vrot.slane %v46_v30, 2 }
  0x27   :  { %v54_v33 = vrot.slane %v53_v31, 2 }
  0x28   :  { %v48_v34 = vadd.f32 %v47_v32, %v46_v30 }
  0x29   :  { %v55_v35 = vadd.f32 %v54_v33, %v53_v31 }
  0x2a   :  { %v49_v36 = vrot.slane %v48_v34, 1 }
  0x2b   :  { %v56_v37 = vrot.slane %v55_v35, 1 }
  0x2c   :  { %v50_v38 = vadd.f32 %v49_v36, %v48_v34 }
  0x2d   :  { %v57_v39 = vadd.f32 %v56_v37, %v55_v35  ;;  %v229_v37 = vmov 0.0  }
  0x2e   :  { %198 = vlog2.f32 %v50_v38 }
  0x2f   :  { %200 = vlog2.f32 %v57_v39 }
  0x38   :  { %v199_v40 = vpop.eup %198 }
  0x39   :  { %v201_v41 = vpop.eup %200  ;;  %v59_v42 = vmul.f32 0.6931472, %v199_v40 }
  0x3a   :  { %v61_v43 = vmul.f32 0.6931472, %v201_v41 }
  0x3b   :  { %v62_v44 = vsub.f32 %v38_v20, %v59_v42 }
  0x3c   :  { %v63_v45 = vsub.f32 %v39_v21, %v61_v43 }
  0x3d   :  { %68 = vperm.xlu0 %193, %v62_v44  }
  0x41   :  { %73 = vperm.xlu0 %193, %v63_v45  }
  0xbc   :  { %v69_v47 = vpop.permute.xlu0 %68 }
  0xbd   :  { %v76_v48 = vadd.f32 %v69_v47, %v64_v46 }
  0xbf   :  { %v81_v50 = vsel %vm80_vm1, %v76_v48, -inf }
  0xc0   :  { %v82_v51 = vrot.slane %v81_v50, 4  ;;  %v74_v52 = vpop.permute.xlu0 %73 }
  0xc1   :  { %v77_v53 = vadd.f32 %v74_v52, %v65_v49 }
  0xc2   :  { %v83_v54 = vmax.f32 %v81_v50, %v82_v51 }
  0xc3   :  { %v88_v55 = vsel %vm80_vm1, %v77_v53, -inf }
  0xc4   :  { %v84_v56 = vrot.slane %v83_v54, 2  ;;  %v89_v57 = vrot.slane %v88_v55, 4 }
  0xc6   :  { %v85_v59 = vmax.f32 %v83_v54, %v84_v56  ;;  %v90_v60 = vmax.f32 %v88_v55, %v89_v57 }
  0xc8   :  { %v86_v61 = vrot.slane %v85_v59, 1  ;;  %v91_v62 = vrot.slane %v90_v60, 2 }
  0xca   :  { %v87_v0 = vmax.f32 %v85_v59, %v86_v61  ;;  %v92_v1 = vmax.f32 %v90_v60, %v91_v62 }
  0xcc   :  { %vm95_vm2 = vcmp.eq.f32.partialorder %v76_v48, %v87_v0  ;;  %v93_v2 = vrot.slane %v92_v1, 1 }
  0xcd   :  { %v97_v3 = vsel %vm95_vm2, %v79_v63, 3 }
  0xce   :  { %v99_v4 = vsel %vm80_vm1, %v97_v3, 2147483647  ;;  %v94_v5 = vmax.f32 %v92_v1, %v93_v2 }
  0xcf   :  { %v100_v6 = vrot.slane %v99_v4, 4 }
  0xd0   :  { %vm96_vm3 = vcmp.eq.f32.partialorder %v77_v53, %v94_v5 }
  0xd1   :  { %vm101_vm4 = vcmp.lt.s32.totalorder %v99_v4, %v100_v6  ;;  %v98_v7 = vsel %vm96_vm3, %v79_v63, 3 }
  0xd2   :  { %v102_v8 = vsel %vm101_vm4, %v99_v4, %v100_v6  ;;  %v109_v9 = vsel %vm80_vm1, %v98_v7, 2147483647 }
  0xd3   :  { %v103_v10 = vrot.slane %v102_v8, 2  ;;  %v110_v11 = vrot.slane %v109_v9, 4 }
  0xd5   :  { %vm104_vm5 = vcmp.lt.s32.totalorder %v102_v8, %v103_v10  ;;  %vm111_vm6 = vcmp.lt.s32.totalorder %v109_v9, %v110_v11 }
  0xd6   :  { %v105_v12 = vsel %vm104_vm5, %v102_v8, %v103_v10  ;;  %v112_v13 = vsel %vm111_vm6, %v109_v9, %v110_v11 }
  0xd7   :  { %v106_v15 = vrot.slane %v105_v12, 1  ;;  %v113_v16 = vrot.slane %v112_v13, 2 }
  0xd9   :  { %vm107_vm7 = vcmp.lt.s32.totalorder %v105_v12, %v106_v15  ;;  %vm114_vm8 = vcmp.lt.s32.totalorder %v112_v13, %v113_v16 }
  0xda   :  { %v108_v17 = vsel %vm107_vm7, %v105_v12, %v106_v15  ;;  %v115_v18 = vsel %vm114_vm8, %v112_v13, %v113_v16 }
  0xdb   :  { %vm119_vm10 = vcmp.eq.s32.totalorder %v79_v63, %v108_v17  ;;  %v116_v19 = vrot.slane %v115_v18, 1  ;;  %v140_v22 = vsel %vm138_vm9, %v108_v17, 0 }
  0xdc   :  { %v121_v20 = vsel %vm119_vm10, %v69_v47, 0.0  ;;  %v146_v27 = vsel %vm144_vm12, %v140_v22, 0 }
  0xdd   :  { %v123_v21 = vsel %vm80_vm1, %v121_v20, 0.0  ;;  %vm117_vm13 = vcmp.lt.s32.totalorder %v115_v18, %v116_v19 }
  0xde   :  { %v124_v23 = vrot.slane %v123_v21, 4  ;;  %v118_v24 = vsel %vm117_vm13, %v115_v18, %v116_v19 }
  0xdf   :  { %vm120_vm14 = vcmp.eq.s32.totalorder %v79_v63, %v118_v24  ;;  %v141_v25 = vsel %vm139_vm11, %v118_v24, 0 }
  0xe0   :  { %v125_v26 = vadd.f32 %v124_v23, %v123_v21  ;;  %v122_v28 = vsel %vm120_vm14, %v74_v52, 0.0  ;;  %v147_v29 = vsel %vm144_vm12, %v141_v25, 0 }
  0xe1   :  { %v130_v30 = vsel %vm80_vm1, %v122_v28, 0.0  ;;  %v148_v31 = vadd.s32 %v147_v29, %v146_v27 }
  0xe2   :  { %v126_v32 = vrot.slane %v125_v26, 2  ;;  %v131_v33 = vrot.slane %v130_v30, 4 }
  0xe3   :  { %vm149_vm0 = vcmp.eq.s32.totalorder %v108_v17, %v148_v31  ;;  %vm150_vm2 = vcmp.eq.s32.totalorder %v118_v24, %v148_v31  ;;  %v162_v34 = vcvt.s32.f32 %v148_v31 }
  0xe4   :  { %v127_v35 = vadd.f32 %v126_v32, %v125_v26  ;;  %v132_v36 = vadd.f32 %v131_v33, %v130_v30  ;;  %v186_v38 = vsel %vm149_vm0, 1.0, %v229_v37  ;;  %v187_v39 = vsel %vm150_vm2, 1.0, %v229_v37 }
  0xe5   :  { %v156_v40 = vsel %vm155_vm15, %v186_v38, 0.0  ;;  %v157_v41 = vsel %vm155_vm15, %v187_v39, 0.0  ;;  %163 = vst.msk [vmem:[#allocation2] sm:$0x1] %vm155_vm15, %v162_v34 }
  0xe6   :  { %v128_v42 = vrot.slane %v127_v35, 1  ;;  %v133_v43 = vrot.slane %v132_v36, 2  ;;  %v158_v44 = vadd.f32 %v157_v41, %v156_v40 }
  0xe8   :  { %v129_v45 = vadd.f32 %v128_v42, %v127_v35  ;;  %v134_v46 = vadd.f32 %v133_v43, %v132_v36  ;;  %202 = vrcp.f32 %v158_v44 }
  0xea   :  { %168 = vst.msk [vmem:[#allocation2 + $0x3] sm:$0x1] %vm155_vm15, %v129_v45  ;;  %v135_v47 = vrot.slane %v134_v46, 1 }
  0xec   :  { %v136_v48 = vadd.f32 %v135_v47, %v134_v46 }
  0xee   :  { %169 = vst.msk [vmem:[#allocation2 + $0x4] sm:$0x1] %vm155_vm15, %v136_v48 }
  0xf2   :  { %v203_v49 = vpop.eup %202 }
  0xf3   :  { %v160_v50 = vmul.f32 %v203_v49, %v186_v38  ;;  %v161_v51 = vmul.f32 %v203_v49, %v187_v39 }
  0xf5   :  { %165 = vst.msk [vmem:[#allocation2 + $0x1] sm:$0x1] %vm155_vm15, %v160_v50  ;;  %166 = vst.msk [vmem:[#allocation2 + $0x2] sm:$0x1] %vm155_vm15, %v161_v51 }
  0xf6   :  { %215 = shalt.err (!%p212_p4)
}
  0xf7   :  { %s216_s29 = scalar_lea.hbm %s309_s4, 80 }
  0xf8   :  { %p217_p5 = scmp.ne.s32.totalorder %s309_s4, %s216_s29  ;;  %p220_p6 = scmp.lt.u32.totalorder %s216_s29, %s309_s4 }
  0xfa   :  { %p222_p7 = pnand %p220_p6, %p217_p5 }
  0xfc   :  { %225 = shalt.err (!%p222_p7)
}
  0xfd   :  { %s231_s8 = smov 16   ;;  %s232_s9 = smov 1  }
  0xfe   :  { %181 = dma.vmem_to_hbm [thread:$0]  %s176_s24, 80, %s309_s4, [#allocation3], %s231_s8, %s231_s8, %s232_s9  }
  0xff   :  { %226 = dma.done.wait [#allocation3], 80  }
 0x100   :  { %227 = vsyncadd [#allocation3], 4294967216 }
 0x101   :  { %185 = vsyncpa [#allocation3], 1 }

</bundles_post_ra>
